<compile_context>
chip_gen: v7x
topology: tpu7x:2x2x1
jax: 0.10.0
libtpu: 0.0.40
codegen_flags: <defaults>
</compile_context>

<pallas_src>
import jax
import jax.numpy as jnp
from jax.experimental import pallas as pl
from jax.experimental.pallas import tpu as pltpu


def attention_kernel(feat_ref, z_ref, wft_ref, wit_ref, b_ref, v_ref,
                     ctx_ref, alpha_ref):
    # Block shapes: feat (bb, F, L) native dtype, z (bb, I) f32, wft (F, A)
    # feat-dtype, wit (I, A) f32, b/v (1, A) f32, ctx (bb, F) f32, alpha (bb, L) f32.
    bb, f, l = feat_ref.shape
    a = wft_ref.shape[1]

    # In-VMEM relayout (XLU transpose, hidden under feature DMA / MXU) of the
    # native-layout block; stays in the feature dtype (no f32 copy).
    tf = jnp.transpose(feat_ref[...], (0, 2, 1))                       # (bb, L, F)

    # One folded MXU matmul per grid step: batch folded into the row dim.
    x2 = tf.reshape(bb * l, f)                                         # (bb*L, F)
    feat_proj = jnp.dot(x2, wft_ref[...],
                        preferred_element_type=jnp.float32)            # (bb*L, A) f32

    # Input projection for the whole batch block (f32).
    inp_proj = jnp.dot(z_ref[...], wit_ref[...],
                       preferred_element_type=jnp.float32) + b_ref[...]  # (bb, A)

    # relu(w_feat(tf) + w_input(z)[:, None, :])
    attn = jnp.maximum(feat_proj.reshape(bb, l, a) + inp_proj[:, None, :],
                       0.0)                                             # (bb, L, A) f32

    # score[b, l] = <attn[b, l, :], v>   (VPU mul + lane reduce; hides under MXU)
    score = jnp.sum(attn * v_ref[...][None, :, :], axis=-1)             # (bb, L)

    # Numerically-stable softmax over L, f32 throughout.
    m = jnp.max(score, axis=-1, keepdims=True)
    e = jnp.exp(score - m)
    denom = jnp.sum(e, axis=-1, keepdims=True)
    alpha = e * pl.reciprocal(denom, approx=True)                       # (bb, L)
    alpha_ref[...] = alpha.astype(alpha_ref.dtype)

    # ctx[b, :] = alpha[b, :] @ tf[b, :, :] -- batched M=1 matmul on the MXU so the
    # feature block stays in its native dtype (v5e-safe, no f32 copy; MXU has slack).
    ctx3 = jnp.einsum("bql,blf->bqf",
                      alpha[:, None, :].astype(tf.dtype), tf,
                      preferred_element_type=jnp.float32)               # (bb, 1, F)
    ctx_ref[...] = ctx3.reshape(bb, f).astype(ctx_ref.dtype)


def _vmem_capacity_bytes():
    """Per-core VMEM capacity; conservative fallback is v7x's 64 MiB."""
    try:
        info = pltpu.get_tpu_info()
        cap = int(getattr(info, "vmem_capacity_bytes", 0))
        if cap > 0:
            return cap
    except Exception:
        pass
    return 64 * 1024 * 1024


def _per_step_vmem_bytes(bb, F, L, I, A, feat_isz):
    """Per-grid-step VMEM footprint, counting double-buffering and the
    in-kernel transposed copy of the feature block."""
    feat_block = bb * F * L * feat_isz
    total = 0
    total += 2 * feat_block                                   # feature input (double-buffered)
    total += feat_block                                       # in-kernel transposed copy
    total += 2 * bb * I * 4                                   # z input
    total += 2 * (F * A * feat_isz + I * A * 4 + 2 * A * 4)   # weights / bias / v
    total += 2 * bb * L * A * 4                               # feat_proj + attn (f32)
    total += 4 * bb * L * 4                                   # score / exp / alpha temporaries
    total += 2 * bb * F * 4 + bb * F * 4                      # ctx output buffers + f32 value
    total += 2 * bb * L * 4                                   # alpha output buffers
    return total


def _choose_block_b(B, F, L, I, A, feat_isz, vmem_cap):
    """Largest batch block that fits ~45% of VMEM (accurate accounting),
    with >=2 grid steps for B >= 16 (v7x megacore) and a preference for
    block sizes that divide B exactly (avoids an HBM padding pass)."""
    budget = int(0.45 * vmem_cap)
    base = _per_step_vmem_bytes(0, F, L, I, A, feat_isz)
    per_row = _per_step_vmem_bytes(1, F, L, I, A, feat_isz) - base
    fit = (budget - base) // per_row if budget > base else 1
    bb = int(max(1, min(B, fit)))
    if B >= 16:
        bb = min(bb, -(-B // 2))      # keep at least 2 grid steps for megacore
    if bb >= B:
        return B                       # single block == full (possibly padded) batch
    bb = max(8, (bb // 8) * 8)         # sublane-aligned blocks for (bb, F)/(bb, L) outputs
    d = bb
    while d > 8 and B % d != 0:
        d -= 8
    if B % d == 0:
        bb = d                         # exact divisor: no batch padding needed
    return bb


def attention_pallas(z, features, w_feat, w_input, b_input, v_attn):
    """z: (B, I); features: (B, F, L) in native layout; weights in PyTorch
    (out, in) convention.  The feature stream is consumed in its own dtype
    (float32 or bfloat16); accumulation/softmax math and outputs are float32."""
    B, F, L = features.shape
    I = z.shape[1]
    A = w_feat.shape[0]
    feat_isz = jnp.dtype(features.dtype).itemsize

    vmem_cap = _vmem_capacity_bytes()
    bb = _choose_block_b(B, F, L, I, A, feat_isz, vmem_cap)
    nb = -(-B // bb)                   # cdiv
    b_pad = nb * bb

    feat = features                    # native (B, F, L): NO wrapper transpose / extra HBM pass
    zf = z.astype(jnp.float32)
    if b_pad != B:
        feat = jnp.pad(feat, ((0, b_pad - B), (0, 0), (0, 0)))
        zf = jnp.pad(zf, ((0, b_pad - B), (0, 0)))

    wf_t = w_feat.T.astype(feat.dtype)         # (F, A) matches the feature dtype for the MXU
    wi_t = w_input.T.astype(jnp.float32)       # (I, A)
    b2 = b_input.reshape(1, A).astype(jnp.float32)
    v2 = v_attn.reshape(1, A).astype(jnp.float32)

    needed = _per_step_vmem_bytes(bb, F, L, I, A, feat_isz)
    vmem_limit = min(max(32 * 1024 * 1024, int(1.25 * needed)),
                     vmem_cap - 16 * 1024 * 1024)
    vmem_limit = int(max(vmem_limit, 16 * 1024 * 1024))
    # TODO(synk): if `needed` exceeds the scoped limit even at bb == 8 (huge F*L),
    # tile L as well (requires a masked online softmax over L chunks).

    ctx, alpha = pl.pallas_call(
        attention_kernel,
        out_shape=(
            jax.ShapeDtypeStruct((b_pad, F), jnp.float32),
            jax.ShapeDtypeStruct((b_pad, L), jnp.float32),
        ),
        grid_spec=pltpu.PrefetchScalarGridSpec(
            num_scalar_prefetch=0,
            grid=(nb,),
            in_specs=[
                pl.BlockSpec((bb, F, L), lambda i: (i, 0, 0)),   # features, native layout
                pl.BlockSpec((bb, I), lambda i: (i, 0)),         # z
                pl.BlockSpec((F, A), lambda i: (0, 0)),          # w_feat^T   (feat dtype)
                pl.BlockSpec((I, A), lambda i: (0, 0)),          # w_input^T  (f32)
                pl.BlockSpec((1, A), lambda i: (0, 0)),          # bias
                pl.BlockSpec((1, A), lambda i: (0, 0)),          # v_attn
            ],
            out_specs=[
                pl.BlockSpec((bb, F), lambda i: (i, 0)),         # ctx
                pl.BlockSpec((bb, L), lambda i: (i, 0)),         # alpha
            ],
        ),
        compiler_params=pltpu.CompilerParams(
            dimension_semantics=("parallel",),   # batch blocks shard across v7x's 2 TCs
            vmem_limit_bytes=vmem_limit,
        ),
    )(feat, zf, wf_t, wi_t, b2, v2)

    return ctx[:B], alpha[:B]


def attention_ref(z, features, w_feat, w_input, b_input, v_attn):
    tf = jnp.transpose(features, (0, 2, 1))                               # (B, L, F)
    attn = jax.nn.relu(tf @ w_feat.T + (z @ w_input.T + b_input)[:, None, :])
    scores = attn @ v_attn                                                # (B, L)
    alpha = jax.nn.softmax(scores, axis=-1)
    ctx = jnp.einsum("bfl,bl->bf", features, alpha)
    return ctx, alpha


if __name__ == "__main__":
    def run_case(key, B, I, F, A, L, atol=2e-3):
        k_z, k_f, k_wf, k_wi, k_b, k_v = jax.random.split(key, 6)
        z = jax.random.normal(k_z, (B, I), dtype=jnp.float32)
        features = jax.random.normal(k_f, (B, F, L), dtype=jnp.float32)
        # Deterministic synthetic parameters, PyTorch (out, in) layout.
        w_feat = jax.random.normal(k_wf, (A, F), dtype=jnp.float32) / jnp.sqrt(F)
        w_input = jax.random.normal(k_wi, (A, I), dtype=jnp.float32) / jnp.sqrt(I)
        b_input = jax.random.normal(k_b, (A,), dtype=jnp.float32) * 0.1
        v_attn = jax.random.normal(k_v, (A,), dtype=jnp.float32) / jnp.sqrt(A)

        ctx, alpha = attention_pallas(z, features, w_feat, w_input, b_input, v_attn)
        ctx, alpha = jax.block_until_ready((ctx, alpha))

        ctx_r, alpha_r = attention_ref(z, features, w_feat, w_input, b_input, v_attn)
        assert ctx.shape == (B, F) and alpha.shape == (B, L)
        assert jnp.allclose(ctx, ctx_r, atol=atol, rtol=atol), \
            f"ctx mismatch (B={B},F={F},L={L}): max err {jnp.max(jnp.abs(ctx - ctx_r))}"
        assert jnp.allclose(alpha, alpha_r, atol=atol, rtol=atol), \
            f"alpha mismatch (B={B},F={F},L={L}): max err {jnp.max(jnp.abs(alpha - alpha_r))}"

    key = jax.random.PRNGKey(0)
    k1, k2 = jax.random.split(key)
    # Small shapes consistent with the module's forward pass.
    run_case(k1, B=2, I=8, F=16, A=32, L=8)
    # Multi-block grid + batch-padding path (bb=8, 3 grid steps, B padded 20 -> 24).
    run_case(k2, B=20, I=16, F=64, A=48, L=24)
    print("KERNEL_OK")
</pallas_src>

<mosaic_0001>
module attributes {stable_mosaic.version = 11 : i64} {
  func.func @attention_kernel(%arg0: i32, %arg1: memref<2x16x8xf32, #tpu.memory_space<vmem>>, %arg2: memref<2x8xf32, #tpu.memory_space<vmem>>, %arg3: memref<16x32xf32, #tpu.memory_space<vmem>>, %arg4: memref<8x32xf32, #tpu.memory_space<vmem>>, %arg5: memref<1x32xf32, #tpu.memory_space<vmem>>, %arg6: memref<1x32xf32, #tpu.memory_space<vmem>>, %arg7: memref<2x16xf32, #tpu.memory_space<vmem>>, %arg8: memref<2x8xf32, #tpu.memory_space<vmem>>) attributes {dimension_semantics = [#tpu.dimension_semantics<parallel>], iteration_bounds = array<i64: 1>, scalar_prefetch = 0 : i64, scratch_operands = 0 : i64, tpu.core_type = #tpu.core_type<tc>, window_params = [{transform_indices = @transform_0, window_bounds = array<i64: 2, 16, 8>}, {transform_indices = @transform_1, window_bounds = array<i64: 2, 8>}, {pipeline_mode = #tpu.pipeline_mode<synchronous>, transform_indices = @transform_2, window_bounds = array<i64: 16, 32>}, {pipeline_mode = #tpu.pipeline_mode<synchronous>, transform_indices = @transform_3, window_bounds = array<i64: 8, 32>}, {pipeline_mode = #tpu.pipeline_mode<synchronous>, transform_indices = @transform_4, window_bounds = array<i64: 1, 32>}, {pipeline_mode = #tpu.pipeline_mode<synchronous>, transform_indices = @transform_5, window_bounds = array<i64: 1, 32>}, {transform_indices = @transform_6, window_bounds = array<i64: 2, 16>}, {transform_indices = @transform_7, window_bounds = array<i64: 2, 8>}]} {
    %c0 = arith.constant 0 : index
    %c0_0 = arith.constant 0 : index
    %c0_1 = arith.constant 0 : index
    %0 = vector.load %arg1[%c0, %c0_0, %c0_1] : memref<2x16x8xf32, #tpu.memory_space<vmem>>, vector<2x16x8xf32>
    %1 = tpu.transpose %0, [0, 2, 1] : vector<2x16x8xf32> -> vector<2x8x16xf32>
    %2 = vector.shape_cast %1 : vector<2x8x16xf32> to vector<16x16xf32>
    %c0_2 = arith.constant 0 : index
    %c0_3 = arith.constant 0 : index
    %3 = vector.load %arg3[%c0_2, %c0_3] : memref<16x32xf32, #tpu.memory_space<vmem>>, vector<16x32xf32>
    %cst = arith.constant dense<0.000000e+00> : vector<16x32xf32>
    %4 = tpu.matmul %2, %3, %cst {dimension_numbers = #tpu.dot_dimension_numbers<[1], [0], [0], [1], [0, 0, 1, 1], [], []>} : vector<16x16xf32>, vector<16x32xf32>, vector<16x32xf32> -> vector<16x32xf32>
    %c0_4 = arith.constant 0 : index
    %c0_5 = arith.constant 0 : index
    %5 = vector.load %arg2[%c0_4, %c0_5] : memref<2x8xf32, #tpu.memory_space<vmem>>, vector<2x8xf32>
    %c0_6 = arith.constant 0 : index
    %c0_7 = arith.constant 0 : index
    %6 = vector.load %arg4[%c0_6, %c0_7] : memref<8x32xf32, #tpu.memory_space<vmem>>, vector<8x32xf32>
    %cst_8 = arith.constant dense<0.000000e+00> : vector<2x32xf32>
    %7 = tpu.matmul %5, %6, %cst_8 {dimension_numbers = #tpu.dot_dimension_numbers<[1], [0], [0], [1], [0, 0, 1, 1], [], []>} : vector<2x8xf32>, vector<8x32xf32>, vector<2x32xf32> -> vector<2x32xf32>
    %c0_9 = arith.constant 0 : index
    %c0_10 = arith.constant 0 : index
    %8 = vector.load %arg5[%c0_9, %c0_10] : memref<1x32xf32, #tpu.memory_space<vmem>>, vector<1x32xf32>
    %9 = vector.broadcast %8 : vector<1x32xf32> to vector<2x32xf32>
    %10 = arith.addf %7, %9 : vector<2x32xf32>
    %11 = vector.shape_cast %4 : vector<16x32xf32> to vector<2x8x32xf32>
    %12 = vector.shape_cast %10 : vector<2x32xf32> to vector<2x1x32xf32>
    %13 = vector.broadcast %12 : vector<2x1x32xf32> to vector<2x8x32xf32>
    %14 = arith.addf %11, %13 : vector<2x8x32xf32>
    %cst_11 = arith.constant 0.000000e+00 : f32
    %15 = vector.broadcast %cst_11 : f32 to vector<2x8x32xf32>
    %16 = arith.maximumf %14, %15 : vector<2x8x32xf32>
    %c0_12 = arith.constant 0 : index
    %c0_13 = arith.constant 0 : index
    %17 = vector.load %arg6[%c0_12, %c0_13] : memref<1x32xf32, #tpu.memory_space<vmem>>, vector<1x32xf32>
    %18 = vector.shape_cast %17 : vector<1x32xf32> to vector<1x1x32xf32>
    %19 = vector.broadcast %18 : vector<1x1x32xf32> to vector<2x8x32xf32>
    %20 = arith.mulf %16, %19 : vector<2x8x32xf32>
    %cst_14 = arith.constant dense<0.000000e+00> : vector<2x8xf32>
    %21 = vector.multi_reduction <add>, %20, %cst_14 [2] : vector<2x8x32xf32> to vector<2x8xf32>
    %cst_15 = arith.constant dense<0xFF800000> : vector<2xf32>
    %22 = vector.multi_reduction <maximumf>, %21, %cst_15 [1] : vector<2x8xf32> to vector<2xf32>
    %23 = vector.shape_cast %22 : vector<2xf32> to vector<2x1xf32>
    %24 = vector.broadcast %23 : vector<2x1xf32> to vector<2x8xf32>
    %25 = arith.subf %21, %24 : vector<2x8xf32>
    %26 = math.exp %25 : vector<2x8xf32>
    %cst_16 = arith.constant dense<0.000000e+00> : vector<2xf32>
    %27 = vector.multi_reduction <add>, %26, %cst_16 [1] : vector<2x8xf32> to vector<2xf32>
    %28 = vector.shape_cast %27 : vector<2xf32> to vector<2x1xf32>
    %29 = tpu.reciprocal %28 {approx = true} : vector<2x1xf32> -> vector<2x1xf32>
    %30 = vector.broadcast %29 : vector<2x1xf32> to vector<2x8xf32>
    %31 = arith.mulf %26, %30 : vector<2x8xf32>
    %c0_17 = arith.constant 0 : index
    %c0_18 = arith.constant 0 : index
    %32 = vector.load %arg8[%c0_17, %c0_18] : memref<2x8xf32, #tpu.memory_space<vmem>>, vector<2x8xf32>
    tpu.vector_store %arg8[%c0_17, %c0_18], %31 {strides = array<i32>} : memref<2x8xf32, #tpu.memory_space<vmem>>, vector<2x8xf32>,
    %33 = vector.shape_cast %31 : vector<2x8xf32> to vector<2x1x8xf32>
    "tpu.trace_start"() <{level = 10 : i32, message = "bql,blf->bqf"}> : () -> ()
    %cst_19 = arith.constant dense<0.000000e+00> : vector<2x1x16xf32>
    %34 = tpu.matmul %33, %1, %cst_19 {dimension_numbers = #tpu.dot_dimension_numbers<[2], [1], [1], [2], [0, 0, 0, 1, 1, 2], [0], [0]>} : vector<2x1x8xf32>, vector<2x8x16xf32>, vector<2x1x16xf32> -> vector<2x1x16xf32>
    "tpu.trace_stop"() : () -> ()
    %35 = vector.shape_cast %34 : vector<2x1x16xf32> to vector<2x16xf32>
    %c0_20 = arith.constant 0 : index
    %c0_21 = arith.constant 0 : index
    %36 = vector.load %arg7[%c0_20, %c0_21] : memref<2x16xf32, #tpu.memory_space<vmem>>, vector<2x16xf32>
    tpu.vector_store %arg7[%c0_20, %c0_21], %35 {strides = array<i32>} : memref<2x16xf32, #tpu.memory_space<vmem>>, vector<2x16xf32>,
    return
  }
  func.func @transform_0(%arg0: i32) -> (i32, i32, i32) {
    %c0_i32 = arith.constant 0 : i32
    %c0_i32_0 = arith.constant 0 : i32
    %c0_i32_1 = arith.constant 0 : i32
    return %arg0, %c0_i32, %c0_i32_0 : i32, i32, i32
  }
  func.func @transform_1(%arg0: i32) -> (i32, i32) {
    %c0_i32 = arith.constant 0 : i32
    %c0_i32_0 = arith.constant 0 : i32
    return %arg0, %c0_i32 : i32, i32
  }
  func.func @transform_2(%arg0: i32) -> (i32, i32) {
    %c0_i32 = arith.constant 0 : i32
    %c0_i32_0 = arith.constant 0 : i32
    %c0_i32_1 = arith.constant 0 : i32
    return %c0_i32, %c0_i32_0 : i32, i32
  }
  func.func @transform_3(%arg0: i32) -> (i32, i32) {
    %c0_i32 = arith.constant 0 : i32
    %c0_i32_0 = arith.constant 0 : i32
    %c0_i32_1 = arith.constant 0 : i32
    return %c0_i32, %c0_i32_0 : i32, i32
  }
  func.func @transform_4(%arg0: i32) -> (i32, i32) {
    %c0_i32 = arith.constant 0 : i32
    %c0_i32_0 = arith.constant 0 : i32
    %c0_i32_1 = arith.constant 0 : i32
    return %c0_i32, %c0_i32_0 : i32, i32
  }
  func.func @transform_5(%arg0: i32) -> (i32, i32) {
    %c0_i32 = arith.constant 0 : i32
    %c0_i32_0 = arith.constant 0 : i32
    %c0_i32_1 = arith.constant 0 : i32
    return %c0_i32, %c0_i32_0 : i32, i32
  }
  func.func @transform_6(%arg0: i32) -> (i32, i32) {
    %c0_i32 = arith.constant 0 : i32
    %c0_i32_0 = arith.constant 0 : i32
    return %arg0, %c0_i32 : i32, i32
  }
  func.func @transform_7(%arg0: i32) -> (i32, i32) {
    %c0_i32 = arith.constant 0 : i32
    %c0_i32_0 = arith.constant 0 : i32
    return %arg0, %c0_i32 : i32, i32
  }
}

</mosaic_0001>

<bundles_post_ra>
// kernel: tpu_custom_call.1
= control target key start
LH: loop header
LB: loop body
LE: loop exit
PB: predicated region body
PF: predicated region fallthrough
CT: control target
= control target key end

     0   :  { %13 = vsyncpa [#allocation3], 0  ;;  %vm188_vm0 = vcmask 64512   ;;  %v689_v6 = vmov 0.0   ;;  %vm690_vm1 = vmmov 0   ;;  %s808_s0 = inlined_call_operand.vmem [shape: f32[2,16,8], index: 0, kind: input, shape index: {}]   ;;  %s809_s1 = inlined_call_operand.vmem [shape: f32[2,8], index: 1, kind: input, shape index: {}]   ;;  %s810_s2 = inlined_call_operand.vmem [shape: f32[16,32], index: 2, kind: input, shape index: {}]   ;;  %s811_s3 = inlined_call_operand.vmem [shape: f32[8,32], index: 3, kind: input, shape index: {}]   ;;  %s812_s4 = inlined_call_operand.vmem [shape: f32[1,32], index: 4, kind: input, shape index: {}]   ;;  %s813_s5 = inlined_call_operand.vmem [shape: f32[1,32], index: 5, kind: input, shape index: {}]   ;;  %s814_s6 = inlined_call_operand.hbm [shape: f32[2,16], index: 6, kind: output, shape index: {0}]   ;;  %s815_s7 = inlined_call_operand.hbm [shape: f32[2,8], index: 7, kind: output, shape index: {1}]  }
   0x1   :  { %v27_v0 = vld [vmem:[%s808_s0] sm:$0xff]  ;;  %v29_v1 = vld [vmem:[%s808_s0 + $0x10] sm:$0xff]  ;;  %v28_v2 = vld [vmem:[%s808_s0 + $0x8] sm:$0xff]  ;;  %608 = vmatprep.subr.mxu1 %v689_v6  ;;  %610 = vmatprep.mubr.msk.f32.mxu1 %vm690_vm1, %v689_v6 }
   0x2   :  { %31 = vxpose.xlu0.b32.start [1/2] (short) (narrow) %v27_v0, 8  ;;  %63 = vxpose.xlu1.b32.start [1/2] (short) (narrow) %v29_v1, 8  ;;  %v30_v3 = vld [vmem:[%s808_s0 + $0x18] sm:$0xff]  ;;  %v180_v4 = vld [vmem:[%s811_s3] sm:$0xff]  ;;  %v96_v8 = vld [vmem:[%s810_s2 + $0x8] sm:$0xff] }
   0x3   :  { %v179_v5 = vld [vmem:[%s809_s1] sm:$0x3] }
   0x4   :  { %v95_v7 = vld [vmem:[%s810_s2] sm:$0xff] }
   0x5   :  { %14 = vsyncpa [#allocation5], 0  ;;  %609 = vmatpush3.msra.mxu1 %v180_v4  ;;  %v623_v9 = vpack.c.bf16 %v96_v8, %v95_v7  ;;  %vm97_vm2 = vcmask 130048   ;;  %v691_v14 = vmov 1966171168   ;;  %v266_v16 = vlaneseq }
   0x6   :  { %611 = vmatmul.mubr.msk.f32.vlgmr.msra.gmra.mrb[0].mxu1 %vm188_vm0, %v179_v5  ;;  %613 = vmatprep.subr.mxu1 %v689_v6  ;;  %v264_v15 = vunpack.c.l.s4 %v691_v14  ;;  %v586_v19 = vld [vmem:[%s812_s4] ss:$0 sm:$0xff]  ;;  %vm308_vm3 = vcmask 261120   ;;  %vm327_vm4 = vcmask 1041409   ;;  %vm330_vm5 = vcmask 58368   ;;  %s693_s4 = smov [#allocation4]  }
   0x7   :  { %32 = vxpose.xlu0.b32.end [2/2] (short) (narrow) %v28_v2, 8  ;;  %64 = vxpose.xlu1.b32.end [2/2] (short) (narrow) %v30_v3, 8  ;;  %v763_v18 = vshrl.u32 %v266_v16, 7  ;;  %v588_v33 = vld [vmem:[%s813_s5] ss:$0 sm:$0xff]  ;;  %v318_v40 = vand.u32 127, %v266_v16 }
   0x8   :  { %624 = vmatprep.subr.bf16.mxu0 %v623_v9  ;;  %615 = vmatprep.mubr.msk.f32.mxu1 %vm690_vm1, %v689_v6  ;;  %v265_v17 = vunpack.c.0.s8 %v264_v15  ;;  %v692_v48 = vmov 0   ;;  %s572_s5 = sshll.u32 %s693_s4, 4  ;;  %s573_s5 = int_to_ptr.vmem [resolvable:$true] %s572_s5 }
   0x9   :  { %626 = vmatpush3.bf16.msra.mxu0 %v623_v9  ;;  %v287_v25 = vsub.s32 0, %v763_v18  ;;  %v321_v41 = vsub.s32 %v318_v40, %v763_v18  ;;  %v341_v49 = vsub.s32 1, %v763_v18  ;;  %s641_s17 = scalar_lea.vmem %s573_s5, 32  ;;  %p646_p1 = scmp.lt.s32.totalorder %s573_s5, %s573_s5 }
   0xa   :  { %618 = vmatprep.subr.mxu0 %v689_v6  ;;  %v268_v21 = vsub.s32 %v265_v17, %v763_v18  ;;  %p642_p0 = scmp.ne.s32.totalorder %s573_s5, %s641_s17  ;;  %p647_p2 = scmp.lt.s32.totalorder %s641_s17, %s641_s17 }
   0xc   :  { %p648_p3 = por %p647_p2, %p646_p1 }
   0xe   :  { %p649_p4 = pnand %p648_p3, %p642_p0 }
  0x25   :  { %633 = vset.pattern.permute.xlu1 %v692_v48 }
  0x30   :  { %634 = vset.pattern.permute.xlu0 %v692_v48 }
  0x83   :  { %v47_v10 = vpop.trf.xlu0  ;;  %v79_v11 = vpop.trf.xlu1 }
  0x84   :  { %605 = vmatprep.mubr.msk.f32.mxu0 %vm97_vm2, %v47_v10  ;;  %614 = vmatpush3.msra.mxu1 %v47_v10 }
  0x85   :  { %606 = vmatmul.mubr.msk.f32.vlgmr.msra.gmra.mrb[0].mxu0 %vm97_vm2, %v79_v11 }
  0x86   :  { %619 = vmatpush3.msra.mxu0 %v79_v11  ;;  %620 = vmatprep.mubr.msk.f32.mxu0 %vm690_vm1, %v689_v6 }
  0xd9   :  { %v258_v12 = vpop.f32.mrb[0].mxu1 }
  0xda   :  { %v612_v13 = vpop.f32.mrb[1].mxu1  ;;  %v259_v20 = vadd.f32 %v586_v19, %v258_v12 }
  0xdc   :  { %v269_v22 = vrot.slane %v259_v20, %v268_v21 }
  0xde   :  { %v270_v23 = vcombine.high %v269_v22, %v269_v22  ;;  %v277_v26 = vrot.slane %v269_v22, %v268_v21 }
  0xe0   :  { %v284_v24 = vrot.slane %v270_v23, %v268_v21  ;;  %v288_v29 = vrot.slane %v277_v26, %v287_v25 }
  0xe2   :  { %v292_v27 = vrot.slane %v284_v24, %v287_v25 }
 0x158   :  { %v607_v28 = vpop.f32.mrb[0].mxu0 }
 0x159   :  { %v296_v30 = vadd.f32 %v607_v28, %v292_v27  ;;  %v170_v31 = vpop.f32.mrb[1].mxu0 }
 0x15a   :  { %v295_v32 = vadd.f32 %v288_v29, %v170_v31 }
 0x15b   :  { %v298_v34 = vmax.f32 %v296_v30, 0.0 }
 0x15c   :  { %v297_v35 = vmax.f32 %v295_v32, 0.0 }
 0x15d   :  { %v307_v36 = vmul.f32 %v588_v33, %v298_v34 }
 0x15e   :  { %v306_v37 = vmul.f32 %v588_v33, %v297_v35 }
 0x15f   :  { %v312_v38 = vsel %vm308_vm3, %v307_v36, 0.0 }
 0x160   :  { %313 = vadd.xlane.f32.xlu1 %v312_v38  ;;  %v309_v39 = vsel %vm308_vm3, %v306_v37, 0.0 }
 0x161   :  { %310 = vadd.xlane.f32.xlu0 %v309_v39 }
 0x1ed   :  { %v314_v42 = vpop.xlane.xlu1 %313 }
 0x1ee   :  { %v326_v43 = vrot.slane %v314_v42, %v321_v41  ;;  %v311_v44 = vpop.xlane.xlu0 %310 }
 0x1ef   :  { %v322_v45 = vrot.slane %v311_v44, %v321_v41 }
 0x1f1   :  { %v328_v46 = vsel %vm327_vm4, %v326_v43, %v322_v45 }
 0x1f2   :  { %v331_v47 = vsel %vm330_vm5, %v328_v46, -inf }
 0x1f3   :  { %332 = vmax.xlane.f32.xlu1 %v331_v47 }
 0x280   :  { %v333_v50 = vpop.xlane.xlu1 %332 }
 0x281   :  { %v338_v51 = vrot.slane %v333_v50, %v287_v25  ;;  %v342_v52 = vrot.slane %v333_v50, %v341_v49 }
 0x283   :  { %v345_v53 = vsub.f32 %v311_v44, %v338_v51  ;;  %v346_v54 = vsub.f32 %v314_v42, %v342_v52 }
 0x285   :  { %v347_v55 = vmul.f32 1.442695, %v345_v53  ;;  %v349_v56 = vmul.f32 1.442695, %v346_v54 }
 0x287   :  { %635 = vpow2.f32 %v347_v55 }
 0x288   :  { %637 = vpow2.f32 %v349_v56 }
 0x291   :  { %v636_v57 = vpop.eup %635 }
 0x292   :  { %v638_v58 = vpop.eup %637  ;;  %354 = vperm.xlu1 %633, %v636_v57  }
 0x293   :  { %357 = vperm.xlu0 %634, %v638_v58  }
 0x311   :  { %v355_v59 = vpop.permute.xlu1 %354 }
 0x312   :  { %v358_v60 = vpop.permute.xlu0 %357  ;;  %v362_v61 = vrot.slane %v355_v59, %v321_v41 }
 0x313   :  { %v366_v62 = vrot.slane %v358_v60, %v321_v41 }
 0x315   :  { %v367_v63 = vsel %vm327_vm4, %v366_v62, %v362_v61 }
 0x316   :  { %v369_v0 = vsel %vm330_vm5, %v367_v63, 0.0 }
 0x317   :  { %370 = vadd.xlane.f32.xlu1 %v369_v0 }
 0x3a4   :  { %v371_v1 = vpop.xlane.xlu1 %370 }
 0x3a5   :  { %639 = vrcp.f32 %v371_v1 }
 0x3af   :  { %v640_v2 = vpop.eup %639 }
 0x3b0   :  { %v381_v3 = vrot.slane %v640_v2, %v341_v49  ;;  %v377_v5 = vrot.slane %v640_v2, %v287_v25 }
 0x3b2   :  { %v385_v4 = vmul.f32 %v638_v58, %v381_v3  ;;  %v384_v6 = vmul.f32 %v636_v57, %v377_v5 }
 0x3b4   :  { %392 = vperm.xlu0 %634, %v385_v4  }
 0x3b8   :  { %389 = vperm.xlu0 %634, %v384_v6  }
 0x433   :  { %v393_v7 = vpop.permute.xlu0 %392 }
 0x434   :  { %v401_v8 = vrot.slane %v393_v7, %v321_v41 }
 0x436   :  { %621 = vmatmul.mubr.msk.f32.vlgmr.msra.gmra.mrb[2].mxu0 %vm188_vm0, %v401_v8 }
 0x437   :  { %v390_v9 = vpop.permute.xlu0 %389 }
 0x438   :  { %v397_v10 = vrot.slane %v390_v9, %v321_v41 }
 0x43a   :  { %616 = vmatmul.mubr.msk.f32.vlgmr.msra.gmra.mrb[2].mxu1 %vm188_vm0, %v397_v10  ;;  %v402_v11 = vsel %vm327_vm4, %v401_v8, %v397_v10 }
 0x43b   :  { %404 = vst.msk [vmem:[#allocation4] sm:$0x3] %vm330_vm5, %v402_v11 }
 0x43c   :  { %652 = shalt.err (!%p649_p4)
}
 0x43d   :  { %s653_s20 = scalar_lea.hbm %s815_s7, 32 }
 0x43e   :  { %p654_p5 = scmp.ne.s32.totalorder %s815_s7, %s653_s20  ;;  %p657_p6 = scmp.lt.u32.totalorder %s653_s20, %s815_s7 }
 0x440   :  { %p659_p7 = pnand %p657_p6, %p654_p5 }
 0x442   :  { %662 = shalt.err (!%p659_p7)
}
 0x443   :  { %575 = dma.vmem_to_hbm [thread:$0]  %s573_s5, 32, %s815_s7, [#allocation5]   ;;  %vm554_vm6 = vcmask 123904  }
 0x444   :  { %s694_s27 = smov [#allocation2]  }
 0x445   :  { %s562_s28 = sshll.u32 %s694_s27, 4  ;;  %s563_s28 = int_to_ptr.vmem [resolvable:$true] %s562_s28 }
 0x446   :  { %s663_s29 = scalar_lea.vmem %s563_s28, 32  ;;  %p668_p9 = scmp.lt.s32.totalorder %s563_s28, %s563_s28 }
 0x447   :  { %p664_p8 = scmp.ne.s32.totalorder %s563_s28, %s663_s29  ;;  %p669_p10 = scmp.lt.s32.totalorder %s663_s29, %s663_s29 }
 0x449   :  { %p670_p11 = por %p669_p10, %p668_p9 }
 0x44b   :  { %p671_p12 = pnand %p670_p11, %p664_p8 }
 0x509   :  { %v545_v12 = vpop.f32.mrb[2].mxu0 }
 0x50a   :  { %v622_v13 = vpop.f32.mrb[3].mxu0  ;;  %v551_v14 = vrot.slane %v545_v12, 7 }
 0x50d   :  { %v473_v15 = vpop.f32.mrb[2].mxu1 }
 0x50e   :  { %v617_v16 = vpop.f32.mrb[3].mxu1  ;;  %v552_v17 = vsel %vm327_vm4, %v551_v14, %v473_v15 }
 0x50f   :  { %555 = vst.msk [vmem:[#allocation2] sm:$0x3] %vm554_vm6, %v552_v17 }
 0x510   :  { %674 = shalt.err (!%p671_p12)
}
 0x511   :  { %s675_s8 = scalar_lea.hbm %s814_s6, 32 }
 0x512   :  { %p676_p13 = scmp.ne.s32.totalorder %s814_s6, %s675_s8  ;;  %p679_p0 = scmp.lt.u32.totalorder %s675_s8, %s814_s6 }
 0x514   :  { %p681_p1 = pnand %p679_p0, %p676_p13 }
 0x516   :  { %684 = shalt.err (!%p681_p1)
}
 0x517   :  { %565 = dma.vmem_to_hbm [thread:$0]  %s563_s28, 32, %s814_s6, [#allocation3]  }
 0x518   :  { %685 = dma.done.wait [#allocation3], 32  }
 0x519   :  { %686 = vsyncadd [#allocation3], 4294967264 }
 0x51a   :  { %687 = dma.done.wait [#allocation5], 32  }
 0x51b   :  { %688 = vsyncadd [#allocation5], 4294967264 }
 0x51c   :  { %582 = vsyncpa [#allocation3], 1 }
 0x51d   :  { %583 = vsyncpa [#allocation5], 1 }

</bundles_post_ra>
